<compile_context>
chip_gen: v7x
topology: tpu7x:2x2x1
jax: 0.10.0
libtpu: 0.0.40
codegen_flags: <defaults>
</compile_context>

<pallas_src>
import functools
import hashlib
import itertools

import numpy as np
import jax
import jax.numpy as jnp
from jax import lax
from jax.experimental import pallas as pl
from jax.experimental.pallas import tpu as pltpu


def _round_up(n, m):
    return ((n + m - 1) // m) * m


# ----------------------------------------------------------------------------
# Pallas kernel: per tile of TN output points
#   g_ref : (TN, KC_pad)    bf16  pre-gathered neighbor features (zero-padded)
#   w_ref : (KC_pad, C_pad) bf16  packed conv weight (zero-padded)
#   p_ref : (8, C_pad)      f32   packed params: row0=bias, row1=gamma, row2=beta
#   o_ref : (TN, Cout)      f32   real channels only (no lane padding in HBM)
# ----------------------------------------------------------------------------
def _spc_conv_kernel(g_ref, w_ref, p_ref, o_ref, *,
                     activate, do_norm, negative_slope, eps, cout):
    # Single lane-dense MXU matmul: (TN, KC_pad) x (KC_pad, C_pad) -> (TN, C_pad).
    out = jnp.dot(g_ref[...], w_ref[...], preferred_element_type=jnp.float32)
    out = out + p_ref[0:1, :]                    # bias, broadcast (1, C_pad)

    if activate:                                 # LeakyReLU(0.2)
        out = jnp.where(out >= 0, out, negative_slope * out)

    if do_norm:                                  # LayerNorm over the REAL channels
        c_pad = out.shape[-1]
        mask = (lax.broadcasted_iota(jnp.int32, (1, c_pad), 1) < cout
                ).astype(jnp.float32)            # static lane mask (cheap VPU work)
        inv_c = 1.0 / float(cout)
        mu = jnp.sum(out * mask, axis=-1, keepdims=True) * inv_c
        d = (out - mu) * mask
        var = jnp.sum(d * d, axis=-1, keepdims=True) * inv_c
        out = (out - mu) * lax.rsqrt(var + eps)
        out = out * p_ref[1:2, :] + p_ref[2:3, :]

    # Store only the real Cout channels (masked vst; HBM sees Cout*4 B/point).
    o_ref[...] = out[:, :cout].astype(o_ref.dtype)


@functools.partial(jax.jit,
                   static_argnames=("activate", "do_norm", "tile_n", "compute_dtype"))
def spc_conv_pallas(nbr_idx, x, weight, bias, ln_gamma, ln_beta, *,
                    activate, do_norm, tile_n=2048, compute_dtype=jnp.bfloat16):
    """nbr_idx: (N, K) int32 (-1 == missing); x: (N, Cin) f32; weight: (K, Cin, Cout)."""
    N, K = nbr_idx.shape
    Cin = x.shape[1]
    Cout = weight.shape[-1]
    KC = K * Cin
    KC_pad = _round_up(KC, 128)                  # contraction dim, lane-padded
    C_pad = _round_up(Cout, 128)                 # matmul output dim, lane-padded

    # --- tile sizing ------------------------------------------------------------
    tile_n = _round_up(max(8, tile_n), 8)
    n_rows = _round_up(max(N, 1), 8)
    tile_n = min(tile_n, n_rows)
    # v7x megacore: keep >= 2 grid steps when the input is large enough to split.
    if n_rows > 1024 and pl.cdiv(n_rows, tile_n) < 2:
        tile_n = _round_up(pl.cdiv(n_rows, 2), 8)
    n_pad = _round_up(N, tile_n)

    # --- pre-gather neighbor features in plain XLA (no in-kernel gather) --------
    # Cast to the compute dtype FIRST so the 27x-expanded slab is bf16 end-to-end.
    # Sentinel zero row at index N stands in for missing (-1) neighbors.
    # TODO(synk): if the gather pass ever rivals the Pallas kernel in the trace,
    # move it on-chip via num_scalar_prefetch=1 + VMEM-resident x (gate on
    # pltpu.get_tpu_info(): v7x has 64 MiB VMEM, not 128).
    x_ext = jnp.concatenate(
        [x.astype(compute_dtype), jnp.zeros((1, Cin), compute_dtype)], axis=0)
    safe_idx = jnp.where(nbr_idx < 0, N, nbr_idx)
    gathered = jnp.take(x_ext, safe_idx, axis=0).reshape(N, KC)      # (N, K*Cin) bf16
    gathered = jnp.pad(gathered, ((0, n_pad - N), (0, KC_pad - KC)))

    # --- pack weight + one (8, C_pad) parameter block ----------------------------
    w2 = weight.reshape(KC, Cout).astype(jnp.float32)
    w2 = jnp.pad(w2, ((0, KC_pad - KC), (0, C_pad - Cout))).astype(compute_dtype)
    params = jnp.zeros((8, C_pad), jnp.float32)
    params = params.at[0, :Cout].set(bias.astype(jnp.float32))
    params = params.at[1, :Cout].set(ln_gamma.astype(jnp.float32))
    params = params.at[2, :Cout].set(ln_beta.astype(jnp.float32))

    kernel = functools.partial(_spc_conv_kernel, activate=activate, do_norm=do_norm,
                               negative_slope=0.2, eps=1e-5, cout=Cout)

    itemsize = jnp.dtype(compute_dtype).itemsize
    cost = pl.CostEstimate(
        flops=2 * n_pad * KC_pad * C_pad,
        transcendentals=n_pad if do_norm else 0,
        bytes_accessed=(n_pad * KC_pad * itemsize        # gathered features
                        + KC_pad * C_pad * itemsize      # weight
                        + 8 * C_pad * 4                  # params
                        + n_pad * Cout * 4))             # output (real channels only)

    out = pl.pallas_call(
        kernel,
        out_shape=jax.ShapeDtypeStruct((n_pad, Cout), jnp.float32),
        grid_spec=pltpu.PrefetchScalarGridSpec(
            num_scalar_prefetch=0,
            grid=(n_pad // tile_n,),
            in_specs=[
                pl.BlockSpec((tile_n, KC_pad), lambda i: (i, 0)),   # gathered feats
                pl.BlockSpec((KC_pad, C_pad), lambda i: (0, 0)),    # packed weight
                pl.BlockSpec((8, C_pad), lambda i: (0, 0)),         # bias/gamma/beta
            ],
            out_specs=pl.BlockSpec((tile_n, Cout), lambda i: (i, 0)),
        ),
        compiler_params=pltpu.CompilerParams(
            dimension_semantics=("parallel",),          # megacore split on v7x
            vmem_limit_bytes=32 * 1024 * 1024),         # safe on 64 MiB v7x
        cost_estimate=cost,
    )(gathered, w2, params)
    return out[:N]


# ----------------------------------------------------------------------------
# Glue: vectorized neighbor-index construction (sort + searchsorted) + cache.
# ----------------------------------------------------------------------------
_NBR_CACHE = {}


def build_neighbor_indices(point_hierarchies, level, pyramids, kernel_vectors):
    start = int(pyramids[0, 1, level])
    num = int(pyramids[0, 0, level])
    coords = np.asarray(point_hierarchies[start:start + num], dtype=np.int64)  # (N,3)
    kvs = np.asarray(kernel_vectors, dtype=np.int64)                           # (K,3)

    shift = int(np.abs(kvs).max()) if kvs.size else 0
    res = int(coords.max()) + 1 if coords.size else 1
    base = np.int64(res + 2 * shift)

    def encode(c):
        return ((c[..., 0] + shift) * base + (c[..., 1] + shift)) * base + (c[..., 2] + shift)

    keys = encode(coords)                                   # unique per point
    order = np.argsort(keys)
    sorted_keys = keys[order]

    nbr_keys = encode(coords[:, None, :] + kvs[None, :, :])  # (N, K)
    pos = np.searchsorted(sorted_keys, nbr_keys)
    pos_c = np.clip(pos, 0, max(num - 1, 0))
    found = sorted_keys[pos_c] == nbr_keys
    return np.where(found, order[pos_c], -1).astype(np.int32)


def cached_neighbor_indices(point_hierarchies, level, pyramids, kernel_vectors):
    # Content-hash cache key (id() can be reused after GC -> stale indices).
    start = int(pyramids[0, 1, level])
    num = int(pyramids[0, 0, level])
    coords = np.ascontiguousarray(np.asarray(point_hierarchies[start:start + num]))
    digest = hashlib.sha1(coords.tobytes()).hexdigest()
    key = (int(level), coords.shape, coords.dtype.str, digest,
           np.ascontiguousarray(np.asarray(kernel_vectors)).tobytes())
    if key not in _NBR_CACHE:
        _NBR_CACHE[key] = build_neighbor_indices(point_hierarchies, level, pyramids,
                                                 kernel_vectors)
    return _NBR_CACHE[key]


class SpcConvWrapperPallas:
    """Mirror of SpcConvWrapper(in_ch, out_ch, kernel_vectors, op=spc_ops.Conv3d,
    jump=0, bias=True, activate, do_norm) with deterministic in-script params."""

    def __init__(self, in_channel, out_channel, kernel_vectors, jump=0, bias=True,
                 activate=False, do_norm=False, key=None, tile_n=2048):
        assert jump == 0  # TODO(synk): jump>0 (strided SPC conv / ConvTranspose3d) not implemented
        self.in_channel = in_channel
        self.out_channel = out_channel
        self.kernel_vectors = np.asarray(kernel_vectors, dtype=np.int16)  # forward() cast
        self.activate, self.do_norm = activate, do_norm
        self.tile_n = tile_n
        K = self.kernel_vectors.shape[0]

        key = jax.random.PRNGKey(0) if key is None else key
        kw, kb = jax.random.split(key)
        # kaolin spc Conv3d weight: (num_kernel_vectors, in_channels, out_channels)
        self.weight = 0.1 * jax.random.normal(kw, (K, in_channel, out_channel), jnp.float32)
        self.bias = (0.01 * jax.random.normal(kb, (out_channel,), jnp.float32)
                     if bias else jnp.zeros((out_channel,), jnp.float32))
        # nn.LayerNorm default init
        self.ln_gamma = jnp.ones((out_channel,), jnp.float32)
        self.ln_beta = jnp.zeros((out_channel,), jnp.float32)

    def __call__(self, octrees, point_hierarchies, level, pyramids, exsum, x):
        # TODO(synk): octrees/exsum-based neighbor traversal (kaolin CUDA spc_ops) has
        # no clean Pallas equivalent; neighbors are resolved from point coords here.
        del octrees, exsum
        nbr_idx = cached_neighbor_indices(point_hierarchies, level, pyramids,
                                          self.kernel_vectors)
        return spc_conv_pallas(jnp.asarray(nbr_idx), x, self.weight, self.bias,
                               self.ln_gamma, self.ln_beta,
                               activate=self.activate, do_norm=self.do_norm,
                               tile_n=self.tile_n)


# ----------------------------------------------------------------------------
# NumPy reference (bf16-quantizes the matmul inputs to mirror the MXU path).
# ----------------------------------------------------------------------------
def reference(nbr_idx, x, w, b, g, be, activate, do_norm):
    def q(a):  # bf16 round-trip, matches the kernel's compute dtype
        return np.asarray(jnp.asarray(a, jnp.bfloat16).astype(jnp.float32))

    x = np.asarray(x, np.float32); w = np.asarray(w, np.float32)
    b = np.asarray(b); g = np.asarray(g); be = np.asarray(be)
    gathered = np.where(nbr_idx[..., None] >= 0,
                        x[np.clip(nbr_idx, 0, None)], 0.0)              # (N, K, Cin)
    out = np.einsum("nkc,kco->no", q(gathered), q(w)).astype(np.float32) + b
    if activate:
        out = np.where(out >= 0, out, 0.2 * out)
    if do_norm:
        mu = out.mean(-1, keepdims=True)
        var = ((out - mu) ** 2).mean(-1, keepdims=True)
        out = (out - mu) / np.sqrt(var + 1e-5) * g + be
    return out


if __name__ == "__main__":
    # Synthetic octree: full hierarchy up to level=2 (res 4 -> 64 leaf points).
    level = 2
    lvl0 = np.array([[0, 0, 0]], dtype=np.int16)
    lvl1 = np.array(list(itertools.product(range(2), repeat=3)), dtype=np.int16)
    lvl2 = np.array(list(itertools.product(range(4), repeat=3)), dtype=np.int16)
    point_hierarchies = np.concatenate([lvl0, lvl1, lvl2], axis=0)         # (73, 3)
    pyramids = np.array([[[1, 8, 64, 0], [0, 1, 9, 73]]], dtype=np.int32)  # (1, 2, 4)
    octrees = np.full((9,), 0xFF, dtype=np.uint8)   # unused by this implementation
    exsum = np.zeros((10,), dtype=np.int32)         # unused by this implementation

    # 3x3x3 kernel -> 27 kernel vectors (as in SparseVoxelTopDownConvNet)
    kernel_vectors = np.array(list(itertools.product([-1, 0, 1], repeat=3)),
                              dtype=np.int16)

    in_channel, out_channel = 4, 8
    key = jax.random.PRNGKey(0)
    k_x, k1, k2, k3 = jax.random.split(key, 4)
    x = jax.random.normal(k_x, (64, in_channel), jnp.float32)   # (num_points, Cin)

    nbr_idx = build_neighbor_indices(point_hierarchies, level, pyramids, kernel_vectors)

    # Cover the three SpcConvWrapper variants used by the net:
    #   processing layers (act+norm), init/downsample (act only), output head (neither).
    # The last config also forces a multi-step grid (tile_n=16 over 64 points) to
    # exercise the tiled path.
    configs = [(True, True, k1, 2048), (True, False, k2, 2048),
               (False, False, k3, 2048), (True, True, k1, 16)]
    for activate, do_norm, kk, tile_n in configs:
        module = SpcConvWrapperPallas(in_channel, out_channel, kernel_vectors,
                                      jump=0, bias=True, activate=activate,
                                      do_norm=do_norm, key=kk, tile_n=tile_n)
        out = module(octrees, point_hierarchies, level, pyramids, exsum, x)
        out = jax.block_until_ready(out)

        ref = reference(nbr_idx, x, module.weight, module.bias,
                        module.ln_gamma, module.ln_beta, activate, do_norm)
        np.testing.assert_allclose(np.asarray(out), ref, rtol=1e-3, atol=1e-5)

    print("KERNEL_OK")
</pallas_src>

<mosaic_0001>
module attributes {stable_mosaic.version = 11 : i64} {
  func.func @_spc_conv_kernel(%arg0: i32, %arg1: memref<64x128xbf16, #tpu.memory_space<vmem>>, %arg2: memref<128x128xbf16, #tpu.memory_space<vmem>>, %arg3: memref<8x128xf32, #tpu.memory_space<vmem>>, %arg4: memref<64x8xf32, #tpu.memory_space<vmem>>) attributes {dimension_semantics = [#tpu.dimension_semantics<parallel>], iteration_bounds = array<i64: 1>, scalar_prefetch = 0 : i64, scratch_operands = 0 : i64, tpu.core_type = #tpu.core_type<tc>, window_params = [{transform_indices = @transform_0, window_bounds = array<i64: 64, 128>}, {pipeline_mode = #tpu.pipeline_mode<synchronous>, transform_indices = @transform_1, window_bounds = array<i64: 128, 128>}, {pipeline_mode = #tpu.pipeline_mode<synchronous>, transform_indices = @transform_2, window_bounds = array<i64: 8, 128>}, {transform_indices = @transform_3, window_bounds = array<i64: 64, 8>}]} {
    %c0 = arith.constant 0 : index
    %c0_0 = arith.constant 0 : index
    %0 = vector.load %arg1[%c0, %c0_0] : memref<64x128xbf16, #tpu.memory_space<vmem>>, vector<64x128xbf16>
    %c0_1 = arith.constant 0 : index
    %c0_2 = arith.constant 0 : index
    %1 = vector.load %arg2[%c0_1, %c0_2] : memref<128x128xbf16, #tpu.memory_space<vmem>>, vector<128x128xbf16>
    %cst = arith.constant dense<0.000000e+00> : vector<64x128xf32>
    %2 = tpu.matmul %0, %1, %cst {dimension_numbers = #tpu.dot_dimension_numbers<[1], [0], [0], [1], [0, 0, 1, 1], [], []>} : vector<64x128xbf16>, vector<128x128xbf16>, vector<64x128xf32> -> vector<64x128xf32>
    %c0_3 = arith.constant 0 : index
    %c0_4 = arith.constant 0 : index
    %3 = vector.load %arg3[%c0_3, %c0_4] : memref<8x128xf32, #tpu.memory_space<vmem>>, vector<1x128xf32>
    %4 = vector.broadcast %3 : vector<1x128xf32> to vector<64x128xf32>
    %5 = arith.addf %2, %4 : vector<64x128xf32>
    %cst_5 = arith.constant 0.000000e+00 : f32
    %6 = vector.broadcast %cst_5 : f32 to vector<64x128xf32>
    %7 = arith.cmpf oge, %5, %6 : vector<64x128xf32>
    %cst_6 = arith.constant 2.000000e-01 : f32
    %8 = vector.broadcast %cst_6 : f32 to vector<64x128xf32>
    %9 = arith.mulf %8, %5 : vector<64x128xf32>
    %10 = arith.select %7, %5, %9 : vector<64x128xi1>, vector<64x128xf32>
    %11 = tpu.iota {dimensions = array<i32: 1>} : vector<1x128xi32>
    %c8_i32 = arith.constant 8 : i32
    %12 = vector.broadcast %c8_i32 : i32 to vector<1x128xi32>
    %13 = arith.cmpi slt, %11, %12 : vector<1x128xi32>
    %14 = arith.extui %13 : vector<1x128xi1> to vector<1x128xi32>
    %15 = arith.sitofp %14 : vector<1x128xi32> to vector<1x128xf32>
    %16 = vector.broadcast %15 : vector<1x128xf32> to vector<64x128xf32>
    %17 = arith.mulf %10, %16 : vector<64x128xf32>
    %cst_7 = arith.constant dense<0.000000e+00> : vector<64xf32>
    %18 = vector.multi_reduction <add>, %17, %cst_7 [1] : vector<64x128xf32> to vector<64xf32>
    %19 = vector.shape_cast %18 : vector<64xf32> to vector<64x1xf32>
    %cst_8 = arith.constant 1.250000e-01 : f32
    %20 = vector.broadcast %cst_8 : f32 to vector<64x1xf32>
    %21 = arith.mulf %19, %20 : vector<64x1xf32>
    %22 = vector.broadcast %21 : vector<64x1xf32> to vector<64x128xf32>
    %23 = arith.subf %10, %22 : vector<64x128xf32>
    %24 = vector.broadcast %15 : vector<1x128xf32> to vector<64x128xf32>
    %25 = arith.mulf %23, %24 : vector<64x128xf32>
    %26 = arith.mulf %25, %25 : vector<64x128xf32>
    %cst_9 = arith.constant dense<0.000000e+00> : vector<64xf32>
    %27 = vector.multi_reduction <add>, %26, %cst_9 [1] : vector<64x128xf32> to vector<64xf32>
    %28 = vector.shape_cast %27 : vector<64xf32> to vector<64x1xf32>
    %cst_10 = arith.constant 1.250000e-01 : f32
    %29 = vector.broadcast %cst_10 : f32 to vector<64x1xf32>
    %30 = arith.mulf %28, %29 : vector<64x1xf32>
    %31 = vector.broadcast %21 : vector<64x1xf32> to vector<64x128xf32>
    %32 = arith.subf %10, %31 : vector<64x128xf32>
    %cst_11 = arith.constant 9.99999974E-6 : f32
    %33 = vector.broadcast %cst_11 : f32 to vector<64x1xf32>
    %34 = arith.addf %30, %33 : vector<64x1xf32>
    %35 = math.rsqrt %34 : vector<64x1xf32>
    %36 = vector.broadcast %35 : vector<64x1xf32> to vector<64x128xf32>
    %37 = arith.mulf %32, %36 : vector<64x128xf32>
    %c1 = arith.constant 1 : index
    %c0_12 = arith.constant 0 : index
    %38 = vector.load %arg3[%c1, %c0_12] : memref<8x128xf32, #tpu.memory_space<vmem>>, vector<1x128xf32>
    %39 = vector.broadcast %38 : vector<1x128xf32> to vector<64x128xf32>
    %40 = arith.mulf %37, %39 : vector<64x128xf32>
    %c2 = arith.constant 2 : index
    %c0_13 = arith.constant 0 : index
    %41 = vector.load %arg3[%c2, %c0_13] : memref<8x128xf32, #tpu.memory_space<vmem>>, vector<1x128xf32>
    %42 = vector.broadcast %41 : vector<1x128xf32> to vector<64x128xf32>
    %43 = arith.addf %40, %42 : vector<64x128xf32>
    %44 = vector.extract_strided_slice %43 {offsets = [0, 0], sizes = [64, 8], strides = [1, 1]} : vector<64x128xf32> to vector<64x8xf32>
    %c0_14 = arith.constant 0 : index
    %c0_15 = arith.constant 0 : index
    %45 = vector.load %arg4[%c0_14, %c0_15] : memref<64x8xf32, #tpu.memory_space<vmem>>, vector<64x8xf32>
    tpu.vector_store %arg4[%c0_14, %c0_15], %44 {strides = array<i32>} : memref<64x8xf32, #tpu.memory_space<vmem>>, vector<64x8xf32>,
    return
  }
  func.func @transform_0(%arg0: i32) -> (i32, i32) {
    %c0_i32 = arith.constant 0 : i32
    %c0_i32_0 = arith.constant 0 : i32
    return %arg0, %c0_i32 : i32, i32
  }
  func.func @transform_1(%arg0: i32) -> (i32, i32) {
    %c0_i32 = arith.constant 0 : i32
    %c0_i32_0 = arith.constant 0 : i32
    %c0_i32_1 = arith.constant 0 : i32
    return %c0_i32, %c0_i32_0 : i32, i32
  }
  func.func @transform_2(%arg0: i32) -> (i32, i32) {
    %c0_i32 = arith.constant 0 : i32
    %c0_i32_0 = arith.constant 0 : i32
    %c0_i32_1 = arith.constant 0 : i32
    return %c0_i32, %c0_i32_0 : i32, i32
  }
  func.func @transform_3(%arg0: i32) -> (i32, i32) {
    %c0_i32 = arith.constant 0 : i32
    %c0_i32_0 = arith.constant 0 : i32
    return %arg0, %c0_i32 : i32, i32
  }
}

</mosaic_0001>

<bundles_post_ra>
// kernel: spc_conv_pallas.1
= control target key start
LH: loop header
LB: loop body
LE: loop exit
PB: predicated region body
PF: predicated region fallthrough
CT: control target
= control target key end

     0   :  { %v205_v12 = vlaneseq  ;;  %v450_v28 = vmov 0.0   ;;  %vm340_vm9 = vcmask 64512   ;;  %s598_s1 = inlined_call_operand.vmem [shape: bf16[128,128], index: 1, kind: input, shape index: {}]   ;;  %s599_s0 = inlined_call_operand.vmem [shape: bf16[64,128], index: 0, kind: input, shape index: {}]   ;;  %s600_s2 = inlined_call_operand.vmem [shape: f32[8,128], index: 2, kind: input, shape index: {}]   ;;  %s601_s3 = inlined_call_operand.vmem [shape: f32[64,8], index: 3, kind: output, shape index: {}]  }
   0x1   :  { %v422_v0 = vld [vmem:[%s598_s1] sm:$0xff]   ;;  %v423_v1 = vld [vmem:[%s598_s1 + $0x8] sm:$0xff]   ;;  %v424_v2 = vld [vmem:[%s598_s1 + $0x10] sm:$0xff]  }
   0x2   :  { %381 = vmatprep.subr.bf16.mxu0 %v422_v0  ;;  %405 = vmatprep.subr.bf16.mxu1 %v422_v0  ;;  %v425_v3 = vld [vmem:[%s598_s1 + $0x18] sm:$0xff]   ;;  %v430_v4 = vld [vmem:[%s599_s0] sm:$0xff]   ;;  %v431_v5 = vld [vmem:[%s599_s0 + $0x10] sm:$0xff]   ;;  %v206_v13 = vand.u32 127, %v205_v12 }
   0x3   :  { %382 = vmatpush3.bf16.msra.mxu0 %v422_v0  ;;  %413 = vmatpush3.bf16.msra.mxu1 %v422_v0  ;;  %v426_v6 = vld [vmem:[%s598_s1 + $0x20] sm:$0xff]   ;;  %v427_v7 = vld [vmem:[%s598_s1 + $0x28] sm:$0xff]   ;;  %v428_v8 = vld [vmem:[%s598_s1 + $0x30] sm:$0xff]  }
   0x4   :  { %383 = vmatprep.subr.bf16.mxu0 %v423_v1  ;;  %406 = vmatprep.subr.bf16.mxu1 %v423_v1  ;;  %v429_v9 = vld [vmem:[%s598_s1 + $0x38] sm:$0xff]   ;;  %v432_v10 = vld [vmem:[%s599_s0 + $0x8] sm:$0xff]   ;;  %v353_v14 = vld [vmem:[%s600_s2] ss:$0 sm:$0xff]  ;;  %vm207_vm0 = vcmp.lt.s32.totalorder %v206_v13, 8 }
   0x5   :  { %397 = vmatprep.mubr.bf16.mxu0 %v430_v4  ;;  %401 = vmatprep.mubr.bf16.mxu1 %v431_v5  ;;  %v433_v11 = vld [vmem:[%s599_s0 + $0x18] sm:$0xff]   ;;  %v510_v29 = vsel %vm207_vm0, 1.0, %v450_v28 }
   0x7   :  { %384 = vmatpush3.bf16.msra.mxu0 %v423_v1  ;;  %414 = vmatpush3.bf16.msra.mxu1 %v423_v1 }
   0x8   :  { %385 = vmatprep.subr.bf16.mxu0 %v424_v2  ;;  %407 = vmatprep.subr.bf16.mxu1 %v424_v2 }
   0xb   :  { %386 = vmatpush3.bf16.msra.mxu0 %v424_v2  ;;  %415 = vmatpush3.bf16.msra.mxu1 %v424_v2 }
   0xc   :  { %387 = vmatprep.subr.bf16.mxu0 %v425_v3  ;;  %408 = vmatprep.subr.bf16.mxu1 %v425_v3 }
   0xf   :  { %388 = vmatpush3.bf16.msra.mxu0 %v425_v3  ;;  %416 = vmatpush3.bf16.msra.mxu1 %v425_v3 }
  0x10   :  { %389 = vmatprep.subr.bf16.mxu0 %v426_v6  ;;  %409 = vmatprep.subr.bf16.mxu1 %v426_v6 }
  0x13   :  { %390 = vmatpush3.bf16.msra.mxu0 %v426_v6  ;;  %417 = vmatpush3.bf16.msra.mxu1 %v426_v6 }
  0x14   :  { %391 = vmatprep.subr.bf16.mxu0 %v427_v7  ;;  %410 = vmatprep.subr.bf16.mxu1 %v427_v7 }
  0x17   :  { %392 = vmatpush3.bf16.msra.mxu0 %v427_v7  ;;  %418 = vmatpush3.bf16.msra.mxu1 %v427_v7 }
  0x18   :  { %393 = vmatprep.subr.bf16.mxu0 %v428_v8  ;;  %411 = vmatprep.subr.bf16.mxu1 %v428_v8 }
  0x1b   :  { %394 = vmatpush3.bf16.msra.mxu0 %v428_v8  ;;  %419 = vmatpush3.bf16.msra.mxu1 %v428_v8 }
  0x1c   :  { %395 = vmatprep.subr.bf16.mxu0 %v429_v9  ;;  %412 = vmatprep.subr.bf16.mxu1 %v429_v9 }
  0x1f   :  { %396 = vmatpush3.bf16.msra.mxu0 %v429_v9  ;;  %420 = vmatpush3.bf16.msra.mxu1 %v429_v9 }
  0x22   :  { %398 = vmatmul.mubr.bf16.vlgmr.msra.gmra.mrb[0].mxu0 %v432_v10  ;;  %402 = vmatmul.mubr.bf16.vlgmr.msra.gmra.mrb[0].mxu1 %v433_v11 }
  0xf5   :  { %v399_v15 = vpop.f32.mrb[0].mxu0  ;;  %v403_v16 = vpop.f32.mrb[0].mxu1 }
  0xf6   :  { %v159_v17 = vadd.f32 %v399_v15, %v353_v14  ;;  %v150_v18 = vpop.f32.mrb[1].mxu0  ;;  %v166_v19 = vpop.f32.mrb[1].mxu1  ;;  %v175_v35 = vadd.f32 %v403_v16, %v353_v14 }
  0xf7   :  { %v151_v20 = vadd.f32 %v353_v14, %v150_v18  ;;  %v167_v21 = vadd.f32 %v353_v14, %v166_v19  ;;  %v400_v22 = vpop.f32.mrb[2].mxu0  ;;  %v404_v23 = vpop.f32.mrb[2].mxu1 }
  0xf8   :  { %v191_v24 = vmul.f32 0.2, %v159_v17  ;;  %v162_v25 = vadd.f32 %v400_v22, %v353_v14  ;;  %v153_v26 = vpop.f32.mrb[3].mxu0  ;;  %v169_v27 = vpop.f32.mrb[3].mxu1  ;;  %vm183_vm1 = vcmp.ge.f32.partialorder %v159_v17, 0.0  ;;  %v178_v36 = vadd.f32 %v404_v23, %v353_v14 }
  0xf9   :  { %v189_v30 = vmul.f32 0.2, %v151_v20  ;;  %v193_v31 = vmul.f32 0.2, %v167_v21  ;;  %v154_v32 = vadd.f32 %v353_v14, %v153_v26  ;;  %v170_v33 = vadd.f32 %v353_v14, %v169_v27 }
  0xfa   :  { %v192_v34 = vmul.f32 0.2, %v162_v25  ;;  %vm181_vm2 = vcmp.ge.f32.partialorder %v151_v20, 0.0  ;;  %v199_v37 = vsel %vm183_vm1, %v159_v17, %v191_v24  ;;  %vm184_vm3 = vcmp.ge.f32.partialorder %v162_v25, 0.0 }
  0xfb   :  { %v197_v38 = vsel %vm181_vm2, %v151_v20, %v189_v30  ;;  %v212_v39 = vmul.f32 %v510_v29, %v199_v37  ;;  %vm185_vm4 = vcmp.ge.f32.partialorder %v167_v21, 0.0  ;;  %v190_v41 = vmul.f32 0.2, %v154_v32 }
  0xfc   :  { %v210_v40 = vmul.f32 %v510_v29, %v197_v38  ;;  %v194_v42 = vmul.f32 0.2, %v170_v33  ;;  %v200_v43 = vsel %vm184_vm3, %v162_v25, %v192_v34  ;;  %v201_v44 = vsel %vm185_vm4, %v167_v21, %v193_v31 }
  0xfd   :  { %222 = vadd.xlane.f32.xlu1 %v212_v39  ;;  %vm186_vm5 = vcmp.ge.f32.partialorder %v170_v33, 0.0  ;;  %vm182_vm6 = vcmp.ge.f32.partialorder %v154_v32, 0.0  ;;  %v213_v45 = vmul.f32 %v510_v29, %v200_v43  ;;  %v214_v46 = vmul.f32 %v510_v29, %v201_v44 }
  0xfe   :  { %218 = vadd.xlane.f32.xlu0 %v210_v40  ;;  %v195_v47 = vmul.f32 0.2, %v175_v35  ;;  %v196_v48 = vmul.f32 0.2, %v178_v36  ;;  %v202_v49 = vsel %vm186_vm5, %v170_v33, %v194_v42  ;;  %v198_v50 = vsel %vm182_vm6, %v154_v32, %v190_v41 }
  0xff   :  { %vm188_vm7 = vcmp.ge.f32.partialorder %v178_v36, 0.0  ;;  %vm187_vm8 = vcmp.ge.f32.partialorder %v175_v35, 0.0  ;;  %v215_v51 = vmul.f32 %v510_v29, %v202_v49  ;;  %v211_v52 = vmul.f32 %v510_v29, %v198_v50 }
 0x100   :  { %v204_v53 = vsel %vm188_vm7, %v178_v36, %v196_v48  ;;  %v203_v54 = vsel %vm187_vm8, %v175_v35, %v195_v47 }
 0x101   :  { %224 = vadd.xlane.f32.xlu1 %v213_v45  ;;  %v217_v55 = vmul.f32 %v510_v29, %v204_v53  ;;  %v216_v56 = vmul.f32 %v510_v29, %v203_v54 }
 0x102   :  { %226 = vadd.xlane.f32.xlu0 %v214_v46 }
 0x105   :  { %228 = vadd.xlane.f32.xlu1 %v215_v51 }
 0x106   :  { %220 = vadd.xlane.f32.xlu0 %v211_v52 }
 0x109   :  { %232 = vadd.xlane.f32.xlu1 %v217_v55 }
 0x10a   :  { %230 = vadd.xlane.f32.xlu0 %v216_v56 }
 0x18a   :  { %v223_v57 = vpop.xlane.xlu1 %222 }
 0x18b   :  { %v219_v58 = vpop.xlane.xlu0 %218  ;;  %v236_v59 = vmul.f32 0.125, %v223_v57 }
 0x18c   :  { %v234_v60 = vmul.f32 0.125, %v219_v58  ;;  %v368_v58 = vld [vmem:[%s600_s2 + $0x2] ss:$0 sm:$0xff] }
 0x18d   :  { %v520_v61 = vsub.f32 %v199_v37, %v236_v59 }
 0x18e   :  { %v522_v62 = vsub.f32 %v197_v38, %v234_v60  ;;  %v225_v63 = vpop.xlane.xlu1 %224 }
 0x18f   :  { %v227_v0 = vpop.xlane.xlu0 %226  ;;  %v237_v1 = vmul.f32 0.125, %v225_v63  ;;  %v252_v3 = vmul.f32 %v510_v29, %v520_v61 }
 0x190   :  { %v238_v2 = vmul.f32 0.125, %v227_v0  ;;  %v250_v7 = vmul.f32 %v510_v29, %v522_v62 }
 0x191   :  { %v526_v4 = vsub.f32 %v200_v43, %v237_v1  ;;  %v260_v6 = vmul.f32 %v252_v3, %v252_v3 }
 0x192   :  { %v528_v5 = vsub.f32 %v201_v44, %v238_v2  ;;  %v229_v8 = vpop.xlane.xlu1 %228  ;;  %v258_v17 = vmul.f32 %v250_v7, %v250_v7 }
 0x193   :  { %v221_v9 = vpop.xlane.xlu0 %220  ;;  %v239_v10 = vmul.f32 0.125, %v229_v8  ;;  %270 = vadd.xlane.f32.xlu0 %v260_v6  ;;  %v253_v12 = vmul.f32 %v510_v29, %v526_v4 }
 0x194   :  { %v235_v11 = vmul.f32 0.125, %v221_v9  ;;  %v254_v13 = vmul.f32 %v510_v29, %v528_v5 }
 0x195   :  { %v536_v14 = vsub.f32 %v202_v49, %v239_v10  ;;  %v261_v16 = vmul.f32 %v253_v12, %v253_v12 }
 0x196   :  { %v538_v15 = vsub.f32 %v198_v50, %v235_v11  ;;  %v233_v18 = vpop.xlane.xlu1 %232  ;;  %v262_v23 = vmul.f32 %v254_v13, %v254_v13 }
 0x197   :  { %v231_v19 = vpop.xlane.xlu0 %230  ;;  %v241_v20 = vmul.f32 0.125, %v233_v18  ;;  %272 = vadd.xlane.f32.xlu1 %v261_v16  ;;  %266 = vadd.xlane.f32.xlu0 %v258_v17  ;;  %v255_v27 = vmul.f32 %v510_v29, %v536_v14 }
 0x198   :  { %v240_v21 = vmul.f32 0.125, %v231_v19  ;;  %v251_v22 = vmul.f32 %v510_v29, %v538_v15 }
 0x199   :  { %v542_v24 = vsub.f32 %v204_v53, %v241_v20  ;;  %v263_v30 = vmul.f32 %v255_v27, %v255_v27  ;;  %v367_v53 = vld [vmem:[%s600_s2 + $0x1] ss:$0 sm:$0xff] }
 0x19a   :  { %v544_v25 = vsub.f32 %v203_v54, %v240_v21  ;;  %v259_v26 = vmul.f32 %v251_v22, %v251_v22 }
 0x19b   :  { %274 = vadd.xlane.f32.xlu0 %v262_v23  ;;  %v257_v32 = vmul.f32 %v510_v29, %v542_v24 }
 0x19c   :  { %268 = vadd.xlane.f32.xlu1 %v259_v26  ;;  %v256_v28 = vmul.f32 %v510_v29, %v544_v25 }
 0x19d   :  { %v265_v33 = vmul.f32 %v257_v32, %v257_v32 }
 0x19e   :  { %v264_v31 = vmul.f32 %v256_v28, %v256_v28 }
 0x1a0   :  { %276 = vadd.xlane.f32.xlu1 %v263_v30  ;;  %278 = vadd.xlane.f32.xlu0 %v264_v31 }
 0x1a4   :  { %280 = vadd.xlane.f32.xlu1 %v265_v33 }
 0x220   :  { %v271_v34 = vpop.xlane.xlu0 %270 }
 0x221   :  { %v284_v35 = vmul.f32 0.125, %v271_v34 }
 0x223   :  { %v292_v36 = vadd.f32 1e-05, %v284_v35 }
 0x224   :  { %v273_v37 = vpop.xlane.xlu1 %272  ;;  %v267_v38 = vpop.xlane.xlu0 %266 }
 0x225   :  { %434 = vrsqrt.f32 %v292_v36  ;;  %v285_v39 = vmul.f32 0.125, %v273_v37  ;;  %v282_v40 = vmul.f32 0.125, %v267_v38 }
 0x227   :  { %v293_v41 = vadd.f32 1e-05, %v285_v39  ;;  %v290_v42 = vadd.f32 1e-05, %v282_v40 }
 0x228   :  { %v275_v43 = vpop.xlane.xlu0 %274 }
 0x229   :  { %v269_v44 = vpop.xlane.xlu1 %268  ;;  %436 = vrsqrt.f32 %v293_v41  ;;  %v286_v45 = vmul.f32 0.125, %v275_v43 }
 0x22a   :  { %v283_v46 = vmul.f32 0.125, %v269_v44  ;;  %438 = vrsqrt.f32 %v290_v42 }
 0x22b   :  { %v294_v29 = vadd.f32 1e-05, %v286_v45 }
 0x22c   :  { %v291_v47 = vadd.f32 1e-05, %v283_v46 }
 0x22d   :  { %v277_v48 = vpop.xlane.xlu1 %276  ;;  %v279_v49 = vpop.xlane.xlu0 %278  ;;  %440 = vrsqrt.f32 %v294_v29 }
 0x22e   :  { %v287_v50 = vmul.f32 0.125, %v277_v48  ;;  %v288_v51 = vmul.f32 0.125, %v279_v49  ;;  %442 = vrsqrt.f32 %v291_v47 }
 0x22f   :  { %v435_v52 = vpop.eup %434 }
 0x230   :  { %v295_v54 = vadd.f32 1e-05, %v287_v50  ;;  %v296_v55 = vadd.f32 1e-05, %v288_v51  ;;  %v308_v56 = vmul.f32 %v435_v52, %v520_v61 }
 0x231   :  { %v281_v57 = vpop.xlane.xlu1 %280 }
 0x232   :  { %444 = vrsqrt.f32 %v295_v54  ;;  %v289_v59 = vmul.f32 0.125, %v281_v57  ;;  %v321_v60 = vmul.f32 %v367_v53, %v308_v56 }
 0x233   :  { %446 = vrsqrt.f32 %v296_v55  ;;  %v437_v63 = vpop.eup %436 }
 0x234   :  { %v297_v0 = vadd.f32 1e-05, %v289_v59  ;;  %v439_v1 = vpop.eup %438  ;;  %v334_v2 = vadd.f32 %v368_v58, %v321_v60  ;;  %v309_v3 = vmul.f32 %v437_v63, %v526_v4 }
 0x235   :  { %v306_v6 = vmul.f32 %v439_v1, %v522_v62 }
 0x236   :  { %448 = vrsqrt.f32 %v297_v0  ;;  %343 = vst.msk [vmem:[%s601_s3 + $0x10] sm:$0xff] %vm340_vm9, %v334_v2  ;;  %v322_v61 = vmul.f32 %v367_v53, %v309_v3 }
 0x237   :  { %v441_v7 = vpop.eup %440  ;;  %v319_v8 = vmul.f32 %v367_v53, %v306_v6 }
 0x238   :  { %v443_v9 = vpop.eup %442  ;;  %v335_v10 = vadd.f32 %v368_v58, %v322_v61  ;;  %v310_v11 = vmul.f32 %v441_v7, %v528_v5 }
 0x239   :  { %v332_v12 = vadd.f32 %v368_v58, %v319_v8  ;;  %v307_v13 = vmul.f32 %v443_v9, %v538_v15 }
 0x23a   :  { %344 = vst.msk [vmem:[%s601_s3 + $0x18] sm:$0xff] %vm340_vm9, %v335_v10  ;;  %v323_v62 = vmul.f32 %v367_v53, %v310_v11 }
 0x23b   :  { %341 = vst.msk [vmem:[%s601_s3] sm:$0xff] %vm340_vm9, %v332_v12  ;;  %v320_v16 = vmul.f32 %v367_v53, %v307_v13 }
 0x23c   :  { %v445_v4 = vpop.eup %444  ;;  %v336_v18 = vadd.f32 %v368_v58, %v323_v62 }
 0x23d   :  { %v447_v17 = vpop.eup %446  ;;  %v311_v5 = vmul.f32 %v445_v4, %v536_v14  ;;  %v333_v19 = vadd.f32 %v368_v58, %v320_v16 }
 0x23e   :  { %v312_v15 = vmul.f32 %v447_v17, %v544_v25  ;;  %345 = vst.msk [vmem:[%s601_s3 + $0x20] sm:$0xff] %vm340_vm9, %v336_v18 }
 0x23f   :  { %v324_v20 = vmul.f32 %v367_v53, %v311_v5  ;;  %342 = vst.msk [vmem:[%s601_s3 + $0x8] sm:$0xff] %vm340_vm9, %v333_v19 }
 0x240   :  { %v449_v21 = vpop.eup %448  ;;  %v325_v22 = vmul.f32 %v367_v53, %v312_v15 }
 0x241   :  { %v337_v23 = vadd.f32 %v368_v58, %v324_v20  ;;  %v313_v26 = vmul.f32 %v449_v21, %v542_v24 }
 0x242   :  { %v338_v14 = vadd.f32 %v368_v58, %v325_v22 }
 0x243   :  { %346 = vst.msk [vmem:[%s601_s3 + $0x28] sm:$0xff] %vm340_vm9, %v337_v23  ;;  %v326_v25 = vmul.f32 %v367_v53, %v313_v26 }
 0x244   :  { %347 = vst.msk [vmem:[%s601_s3 + $0x30] sm:$0xff] %vm340_vm9, %v338_v14 }
 0x245   :  { %v339_v27 = vadd.f32 %v368_v58, %v326_v25 }
 0x247   :  { %348 = vst.msk [vmem:[%s601_s3 + $0x38] sm:$0xff] %vm340_vm9, %v339_v27 }

</bundles_post_ra>
